<compile_context>
chip_gen: v5e
topology: v5e:2x2
jax: 0.10.0
libtpu: 0.0.40
codegen_flags: <defaults>
</compile_context>

<pallas_src>
import functools
import math

import jax
import jax.numpy as jnp
from jax.experimental import pallas as pl
from jax.experimental.pallas import tpu as pltpu


# ----------------------------------------------------------------------------
# small helpers
# ----------------------------------------------------------------------------
def _round_up(x, m):
    return ((x + m - 1) // m) * m


def _pick_tile(dim, target, align):
    """Largest multiple of `align` <= target that evenly divides `dim`,
    or the full dim if it is small / has no aligned divisor."""
    if dim <= target:
        return dim
    t = (target // align) * align
    while t > align and dim % t != 0:
        t -= align
    return t if (t >= align and dim % t == 0) else dim


# ----------------------------------------------------------------------------
# Pallas kernels
# ----------------------------------------------------------------------------
def _linear_kernel(x_ref, w_ref, b_ref, o_ref, acc_ref):
    # y = x @ W + b ; K-reduction over innermost ("arbitrary") grid axis with a
    # resident f32 VMEM accumulator.  Bias add / cast in f32 (v5e-safe epilogue).
    @pl.when(pl.program_id(2) == 0)
    def _init():
        acc_ref[...] = jnp.zeros_like(acc_ref)

    acc_ref[...] += jnp.dot(
        x_ref[...], w_ref[...], preferred_element_type=jnp.float32
    )

    @pl.when(pl.program_id(2) == pl.num_programs(2) - 1)
    def _finalize():
        o_ref[...] = (acc_ref[...] + b_ref[...]).astype(o_ref.dtype)


def _ema_kernel(omd_ref, shadow_ref, param_ref, out_ref):
    # shadow_new = shadow - (1 - decay) * (shadow - param)
    #            = shadow + (1 - decay) * (param - shadow)      (single FMA/block)
    omd = omd_ref[0]                       # scalar (1 - decay) from SMEM
    s = shadow_ref[...]
    out_ref[...] = s + omd * (param_ref[...] - s)


# ----------------------------------------------------------------------------
# jitted wrappers
# ----------------------------------------------------------------------------
@jax.jit
def linear_forward(x, w, b):
    """y = x @ w + b via a tiled Pallas matmul (f32 accumulate on the MXU)."""
    M, K = x.shape
    K2, N = w.shape
    assert K == K2
    tm = _pick_tile(M, 128, 8)
    tn = _pick_tile(N, 256, 128)
    tk = _pick_tile(K, 256, 128)
    b2d = b.reshape(1, N).astype(jnp.float32)
    grid = (M // tm, N // tn, K // tk)
    return pl.pallas_call(
        _linear_kernel,
        out_shape=jax.ShapeDtypeStruct((M, N), jnp.float32),
        grid=grid,
        in_specs=[
            pl.BlockSpec((tm, tk), lambda i, j, k: (i, k)),
            pl.BlockSpec((tk, tn), lambda i, j, k: (k, j)),
            pl.BlockSpec((1, tn), lambda i, j, k: (0, j)),
        ],
        out_specs=pl.BlockSpec((tm, tn), lambda i, j, k: (i, j)),
        scratch_shapes=[pltpu.VMEM((tm, tn), jnp.float32)],
        compiler_params=pltpu.CompilerParams(
            dimension_semantics=("parallel", "parallel", "arbitrary")
        ),
    )(x, w, b2d)


@functools.partial(
    jax.jit,
    static_argnames=("decay", "warmup_denominator", "row_tile"),
    donate_argnames=("shadow_slab",),
)
def ema_update_slab(num_updates, shadow_slab, param_slab, *,
                    decay, warmup_denominator, row_tile):
    """One fused dispatch: bump the on-device step counter, compute the warmup
    decay, and run the in-place (aliased + donated) EMA update on the
    persistent [rows, 128] slab."""
    rows, lanes = shadow_slab.shape
    assert rows % row_tile == 0 and lanes == 128

    n = num_updates + 1
    d = jnp.minimum(decay, (1.0 + n) / (warmup_denominator + n))
    omd = (1.0 - d).astype(jnp.float32).reshape(1)      # (1 - decay) scalar

    nbytes = rows * lanes * 4
    new_shadow = pl.pallas_call(
        _ema_kernel,
        out_shape=jax.ShapeDtypeStruct(shadow_slab.shape, shadow_slab.dtype),
        grid=(rows // row_tile,),
        in_specs=[
            pl.BlockSpec(memory_space=pltpu.MemorySpace.SMEM),      # (1-decay)
            pl.BlockSpec((row_tile, 128), lambda i: (i, 0)),        # shadow
            pl.BlockSpec((row_tile, 128), lambda i: (i, 0)),        # params
        ],
        out_specs=pl.BlockSpec((row_tile, 128), lambda i: (i, 0)),
        # shadow (flat input index 1, after the SMEM scalar) aliases output 0:
        # the update reuses the shadow HBM buffer instead of allocating a new slab.
        input_output_aliases={1: 0},
        cost_estimate=pl.CostEstimate(
            flops=2 * rows * lanes, transcendentals=0, bytes_accessed=3 * nbytes
        ),
        compiler_params=pltpu.CompilerParams(
            dimension_semantics=("parallel",)   # shards blocks across v7x's 2 TCs
        ),
    )(omd, shadow_slab, param_slab)
    return new_shadow, n


# ----------------------------------------------------------------------------
# persistent packed-parameter storage (layout decided once, at construction)
# ----------------------------------------------------------------------------
class _ParamPacker:
    LANES = 128
    MAX_ROW_TILE = 2048     # 2048 * 128 * 4 B = 1 MiB per operand block

    def __init__(self, params):
        self.names = list(params.keys())
        self.shapes = [tuple(params[k].shape) for k in self.names]
        self.sizes = [int(math.prod(s)) if s else 1 for s in self.shapes]
        self.total = sum(self.sizes)
        rows = max(1, (self.total + self.LANES - 1) // self.LANES)
        self.row_tile = min(self.MAX_ROW_TILE, _round_up(rows, 8))
        self.padded_rows = _round_up(rows, self.row_tile)

    def pack(self, params):
        flat = jnp.concatenate(
            [jnp.ravel(params[k]).astype(jnp.float32) for k in self.names]
        )
        pad = self.padded_rows * self.LANES - self.total
        if pad:
            flat = jnp.pad(flat, (0, pad))
        return flat.reshape(self.padded_rows, self.LANES)

    def unpack(self, slab):
        flat = slab.reshape(-1)
        out, off = {}, 0
        for k, shape, n in zip(self.names, self.shapes, self.sizes):
            out[k] = flat[off: off + n].reshape(shape)
            off += n
        return out


# ----------------------------------------------------------------------------
# EMAWrapper (JAX port; state lives in plain Python attributes)
# ----------------------------------------------------------------------------
class EMAWrapper:
    def __init__(self, params, decay=0.999, warmup_denominator=10.0):
        self.decay = float(decay)
        self.warmup_denominator = float(warmup_denominator)
        self.num_updates = jnp.asarray(0, dtype=jnp.int32)   # on-device counter
        self.training = True
        self._packer = _ParamPacker(params)
        self.param_slab = self._packer.pack(params)           # live params (packed)
        # separate buffer so the shadow slab can always be cleanly donated in-place
        self.shadow_slab = jnp.array(self.param_slab, copy=True)
        self.backup_slab = None
        self._fwd_params = None                                # lazily unpacked cache

    # --- parameter access ----------------------------------------------------
    @property
    def params(self):
        if self._fwd_params is None:
            self._fwd_params = self._packer.unpack(self.param_slab)
        return self._fwd_params

    @property
    def shadow_params(self):
        return self._packer.unpack(self.shadow_slab)

    def set_model_params(self, params):
        """Install new live model params (packs once per change, i.e. per train step)."""
        self.param_slab = self._packer.pack(params)
        self._fwd_params = None

    # --- mode switching --------------------------------------------------------
    def train(self, mode=True):
        if self.training and not mode:
            self.backup()
            self.copy_to_model()
        elif (not self.training) and mode:
            self.restore_to_model()
        self.training = mode

    def eval(self):
        self.train(False)

    # --- EMA machinery ----------------------------------------------------------
    def update_ema(self):
        # fully on-device: counter bump + warmup decay + aliased Pallas update
        self.shadow_slab, self.num_updates = ema_update_slab(
            self.num_updates, self.shadow_slab, self.param_slab,
            decay=self.decay,
            warmup_denominator=self.warmup_denominator,
            row_tile=self._packer.row_tile,
        )

    def copy_to_model(self):
        # real copy (mirrors torch's param.data.copy_) so param/shadow never
        # share a buffer — keeps shadow-slab donation in update_ema() clean.
        self.param_slab = jnp.array(self.shadow_slab, copy=True)
        self._fwd_params = None

    def backup(self):
        self.backup_slab = self.param_slab

    def restore_to_model(self):
        self.param_slab = self.backup_slab
        self._fwd_params = None

    # --- forward -------------------------------------------------------------------
    def __call__(self, x):
        p = self.params
        return linear_forward(x, p["w"], p["b"])


# ----------------------------------------------------------------------------
if __name__ == "__main__":
    B, D, H = 8, 512, 256   # small; slab = 1026 rows -> padded 1032 (single block)

    key = jax.random.PRNGKey(0)
    kx, kw, kb, kg = jax.random.split(key, 4)

    w = jax.random.normal(kw, (D, H), dtype=jnp.float32) * 0.02
    b = jax.random.normal(kb, (H,), dtype=jnp.float32) * 0.01
    x = jax.random.normal(kx, (B, D), dtype=jnp.float32)

    ema = EMAWrapper({"w": w, "b": b}, decay=0.999, warmup_denominator=10.0)

    # forward with current weights (tiled MXU matmul kernel)
    y0 = ema(x)
    jax.block_until_ready(y0)
    ref0 = x @ w + b[None, :]
    assert jnp.allclose(y0, ref0, rtol=2e-3, atol=2e-3), "forward mismatch"

    # simulate a training step: new model params, then EMA update
    new_w = w + 0.1 * jax.random.normal(kg, (D, H), dtype=jnp.float32)
    new_b = b + 0.05
    ema.set_model_params({"w": new_w, "b": new_b})
    ema.update_ema()
    shadow = ema.shadow_params
    jax.block_until_ready(shadow["w"])

    d1 = min(0.999, (1 + 1) / (10 + 1))
    ref_shadow_w = w - (1.0 - d1) * (w - new_w)
    ref_shadow_b = b - (1.0 - d1) * (b - new_b)
    assert jnp.allclose(shadow["w"], ref_shadow_w, atol=1e-5), "ema w mismatch"
    assert jnp.allclose(shadow["b"], ref_shadow_b, atol=1e-5), "ema b mismatch"

    # second update exercises the warmup decay schedule again
    ema.update_ema()
    d2 = min(0.999, (1 + 2) / (10 + 2))
    ref_shadow_w = ref_shadow_w - (1.0 - d2) * (ref_shadow_w - new_w)
    ref_shadow_b = ref_shadow_b - (1.0 - d2) * (ref_shadow_b - new_b)
    shadow = ema.shadow_params
    jax.block_until_ready(shadow["w"])
    assert jnp.allclose(shadow["w"], ref_shadow_w, atol=1e-5), "ema w mismatch (2)"
    assert jnp.allclose(shadow["b"], ref_shadow_b, atol=1e-5), "ema b mismatch (2)"

    # eval(): backup current weights, activate EMA weights; forward uses them
    ema.eval()
    y_ema = ema(x)
    jax.block_until_ready(y_ema)
    ref_ema = x @ ref_shadow_w + ref_shadow_b[None, :]
    assert jnp.allclose(y_ema, ref_ema, rtol=2e-3, atol=2e-3), "eval-mode forward mismatch"

    # train(): restore the live (perturbed) weights
    ema.train()
    y_tr = ema(x)
    jax.block_until_ready(y_tr)
    ref_tr = x @ new_w + new_b[None, :]
    assert jnp.allclose(y_tr, ref_tr, rtol=2e-3, atol=2e-3), "train-mode restore mismatch"

    print("KERNEL_OK")
</pallas_src>

<mosaic_0001>
module attributes {stable_mosaic.version = 11 : i64} {
  func.func @_linear_kernel(%arg0: i32, %arg1: i32, %arg2: i32, %arg3: memref<8x256xf32, #tpu.memory_space<vmem>>, %arg4: memref<256x256xf32, #tpu.memory_space<vmem>>, %arg5: memref<1x256xf32, #tpu.memory_space<vmem>>, %arg6: memref<8x256xf32, #tpu.memory_space<vmem>>, %arg7: memref<8x256xf32, #tpu.memory_space<vmem>>) attributes {dimension_semantics = [#tpu.dimension_semantics<parallel>, #tpu.dimension_semantics<parallel>, #tpu.dimension_semantics<arbitrary>], iteration_bounds = array<i64: 1, 1, 2>, scalar_prefetch = 0 : i64, scratch_operands = 1 : i64, tpu.core_type = #tpu.core_type<tc>, window_params = [{transform_indices = @transform_0, window_bounds = array<i64: 8, 256>}, {transform_indices = @transform_1, window_bounds = array<i64: 256, 256>}, {transform_indices = @transform_2, window_bounds = array<i64: 1, 256>}, {transform_indices = @transform_3, window_bounds = array<i64: 8, 256>}]} {
    %c0_i32 = arith.constant 0 : i32
    %0 = arith.cmpi eq, %arg2, %c0_i32 : i32
    %1 = arith.extui %0 : i1 to i32
    %c0_i32_0 = arith.constant 0 : i32
    %2 = arith.cmpi ne, %1, %c0_i32_0 : i32
    scf.if %2 {
      %cst_9 = arith.constant 0.000000e+00 : f32
      %12 = vector.broadcast %cst_9 : f32 to vector<8x256xf32>
      %c0_10 = arith.constant 0 : index
      %c0_11 = arith.constant 0 : index
      %13 = vector.load %arg7[%c0_10, %c0_11] : memref<8x256xf32, #tpu.memory_space<vmem>>, vector<8x256xf32>
      tpu.vector_store %arg7[%c0_10, %c0_11], %12 {strides = array<i32>} : memref<8x256xf32, #tpu.memory_space<vmem>>, vector<8x256xf32>,
    } else {
    }
    %c0 = arith.constant 0 : index
    %c0_1 = arith.constant 0 : index
    %3 = vector.load %arg7[%c0, %c0_1] : memref<8x256xf32, #tpu.memory_space<vmem>>, vector<8x256xf32>
    %c0_2 = arith.constant 0 : index
    %c0_3 = arith.constant 0 : index
    %4 = vector.load %arg3[%c0_2, %c0_3] : memref<8x256xf32, #tpu.memory_space<vmem>>, vector<8x256xf32>
    %c0_4 = arith.constant 0 : index
    %c0_5 = arith.constant 0 : index
    %5 = vector.load %arg4[%c0_4, %c0_5] : memref<256x256xf32, #tpu.memory_space<vmem>>, vector<256x256xf32>
    %cst = arith.constant dense<0.000000e+00> : vector<8x256xf32>
    %6 = tpu.matmul %4, %5, %cst {dimension_numbers = #tpu.dot_dimension_numbers<[1], [0], [0], [1], [0, 0, 1, 1], [], []>} : vector<8x256xf32>, vector<256x256xf32>, vector<8x256xf32> -> vector<8x256xf32>
    %7 = arith.addf %3, %6 : vector<8x256xf32>
    %c0_6 = arith.constant 0 : index
    %c0_7 = arith.constant 0 : index
    %8 = vector.load %arg7[%c0_6, %c0_7] : memref<8x256xf32, #tpu.memory_space<vmem>>, vector<8x256xf32>
    tpu.vector_store %arg7[%c0_6, %c0_7], %7 {strides = array<i32>} : memref<8x256xf32, #tpu.memory_space<vmem>>, vector<8x256xf32>,
    %c1_i32 = arith.constant 1 : i32
    %9 = arith.cmpi eq, %arg2, %c1_i32 : i32
    %10 = arith.extui %9 : i1 to i32
    %c0_i32_8 = arith.constant 0 : i32
    %11 = arith.cmpi ne, %10, %c0_i32_8 : i32
    scf.if %11 {
      %c0_9 = arith.constant 0 : index
      %c0_10 = arith.constant 0 : index
      %12 = vector.load %arg7[%c0_9, %c0_10] : memref<8x256xf32, #tpu.memory_space<vmem>>, vector<8x256xf32>
      %c0_11 = arith.constant 0 : index
      %c0_12 = arith.constant 0 : index
      %13 = vector.load %arg5[%c0_11, %c0_12] : memref<1x256xf32, #tpu.memory_space<vmem>>, vector<1x256xf32>
      %14 = vector.broadcast %13 : vector<1x256xf32> to vector<8x256xf32>
      %15 = arith.addf %12, %14 : vector<8x256xf32>
      %c0_13 = arith.constant 0 : index
      %c0_14 = arith.constant 0 : index
      %16 = vector.load %arg6[%c0_13, %c0_14] : memref<8x256xf32, #tpu.memory_space<vmem>>, vector<8x256xf32>
      tpu.vector_store %arg6[%c0_13, %c0_14], %15 {strides = array<i32>} : memref<8x256xf32, #tpu.memory_space<vmem>>, vector<8x256xf32>,
    } else {
    }
    return
  }
  func.func @transform_0(%arg0: i32, %arg1: i32, %arg2: i32) -> (i32, i32) {
    %c0_i32 = arith.constant 0 : i32
    return %arg0, %arg2 : i32, i32
  }
  func.func @transform_1(%arg0: i32, %arg1: i32, %arg2: i32) -> (i32, i32) {
    %c0_i32 = arith.constant 0 : i32
    return %arg2, %arg1 : i32, i32
  }
  func.func @transform_2(%arg0: i32, %arg1: i32, %arg2: i32) -> (i32, i32) {
    %c0_i32 = arith.constant 0 : i32
    %c0_i32_0 = arith.constant 0 : i32
    return %c0_i32, %arg1 : i32, i32
  }
  func.func @transform_3(%arg0: i32, %arg1: i32, %arg2: i32) -> (i32, i32) {
    %c0_i32 = arith.constant 0 : i32
    return %arg0, %arg1 : i32, i32
  }
}

</mosaic_0001>

<bundles_post_ra>
// kernel: linear_forward.1
= control target key start
LH: loop header
LB: loop body
LE: loop exit
PB: predicated region body
PF: predicated region fallthrough
CT: control target
= control target key end

     0   :  { %8 = vsyncpa [#allocation4], 0  ;;  %s1025_s0 = inlined_call_operand.hbm [shape: f32[8,512], index: 0, kind: input, shape index: {}]   ;;  %s1026_s1 = inlined_call_operand.hbm [shape: f32[512,256], index: 1, kind: input, shape index: {}]   ;;  %s1027_s2 = inlined_call_operand.vmem [shape: f32[1,256], index: 2, kind: input, shape index: {}]   ;;  %s1028_s3 = inlined_call_operand.hbm [shape: f32[8,256], index: 3, kind: output, shape index: {}]  }
   0x1   :  { %10 = vsyncpa [#allocation4 + $0x1], 0 }
   0x2   :  { %11 = vsyncpa [#allocation7], 0 }
   0x3   :  { %13 = vsyncpa [#allocation7 + $0x1], 0 }
   0x4   :  { %14 = vsyncpa [#allocation5], 0  ;;  %s838_s12 = smov 0   ;;  %s840_s13 = smov 0  }
   0x5   :  { %s842_s14 = smov 0   ;;  %s844_s15 = smov 0  }
   0x6   :  { %s846_s16 = smov 0   ;;  %s848_s17 = smov 0  }
   0x7 LB: > { %s573_s18 = sadd.s32 4294967295, %s812_s17   ;;  %s32_s19 = sadd.s32 1, %s808_s16  ;;  %s812_s17 = sphi %s848_s17, %s20_s17   ;;  %s808_s16 = sphi %s846_s16, %s1036_s16   ;;  %s804_s15 = sphi %s844_s15, %s1035_s15   ;;  %s800_s14 = sphi %s842_s14, %s1034_s14   ;;  %s796_s13 = sphi %s840_s13, %s1033_s13   ;;  %s792_s12 = sphi %s838_s12, %s1032_s12  }
   0x8   : > { %p33_p0 = scmp.ge.s32.totalorder %s32_s19, 2  ;;  %s48_s20 = sadd.s32 1, %s800_s14 }
   0x9   : > { %p55_p1 = scmp.ne.s32.totalorder %s800_s14, %s796_s13  ;;  %p56_p2 = scmp.eq.s32.totalorder %s812_s17, 0 }
   0xa   : > { %s1038_s19 = smov (%p33_p0, %s32_s19), 0  ;;  %p61_p4 = scmp.ne.s32.totalorder %s796_s13, %s792_s12 }
   0xb   : > { %p874_p3 = por %p56_p2, %p55_p1  ;;  %s44_s22 = ssub.s32 %s808_s16, %s1038_s19 }
   0xc   : > { %p62_p5 = scmp.eq.s32.totalorder %s573_s18, 0  ;;  %p46_p6 = scmp.eq.s32.totalorder %s44_s22, 0 }
   0xd   : > { %p611_p8 = scmp.lt.s32.totalorder %s812_s17, 2  ;;  %s892_s25 = sand.u32 1, %s800_s14  }
   0xe   : > { %p883_p7 = por %p62_p5, %p61_p4  ;;  %s593_s26 = sshll.u32 %s808_s16, 4 }
   0xf   : > { %s889_s24 = scalar_select %p46_p6, %s800_s14, %s48_s20  }
  0x10   : > { %s577_s27 = sshll.u32 %s892_s25, 4  ;;  %s186_s30 = scalar_lea.hbm %s1025_s0, %s593_s26 }
  0x11   : > { %s188_s4 = sshll.u32 %s186_s30, 4  ;;  %s179_s5 = scalar_lea.vmem [#allocation3], %s577_s27  ;;  %s189_s4 = int_to_ptr.hbm [resolvable:$true] %s188_s4 }
  0x12   : > { %s190_s6 = sshll.u32 %s179_s5, 4  ;;  %p901_p9 = pnand %p611_p8, %p874_p3  ;;  %s191_s6 = int_to_ptr.vmem [resolvable:$true] %s190_s6 }
  0x13   : > { %p584_p10 = scmp.ge.s32.totalorder %s812_s17, 1  ;;  %p220_p11 = scmp.lt.s32.totalorder %s812_s17, 3 }
  0x14   : > { %s580_s8 = sshll.u32 %s892_s25, 9  ;;  %s176_s9 = scalar_lea.sflag [#allocation4], %s892_s25 }
  0x15   : > { %607 = dma.hbm_to_vmem [thread:$0]  (!%p901_p9), %s189_s4, 256, %s191_s6, %s176_s9  }
  0x16   : > { %p221_p12 = pnand %p584_p10, %p220_p11  ;;  %s595_s10 = sshll.u32 %s808_s16, 9 }
  0x17   : > { %s201_s11 = scalar_lea.vmem [#allocation6], %s580_s8  ;;  %s209_s21 = scalar_lea.hbm %s1026_s1, %s595_s10 }
  0x18   : > { %s212_s12 = sshll.u32 %s201_s11, 4  ;;  %s210_s26 = sshll.u32 %s209_s21, 4  ;;  %s213_s12 = int_to_ptr.vmem [resolvable:$true] %s212_s12  ;;  %s211_s26 = int_to_ptr.hbm [resolvable:$true] %s210_s26 }
  0x19   : > { %s198_s27 = scalar_lea.sflag [#allocation7], %s892_s25  ;;  %s814_s28 = smov 256  }
  0x1a   : > { %s815_s29 = smov 16   ;;  %224 = sbr.rel (%p221_p12) target bundleno = 231 (0xe7), region = 32 }
  0x1b   : > { %610 = dma.hbm_to_vmem [thread:$0]  (!%p901_p9), %s211_s26, 8192, %s213_s12, %s198_s27, %s814_s28, %s814_s28, %s815_s29  }
  0x1c   : > { %s226_s30 = sand.u32 (!%p221_p12), 1, %s796_s13  }
  0x1d   : > { %s585_s4 = sshll.u32 (!%p221_p12), %s226_s30, 4  ;;  %s227_s5 = scalar_lea.sflag (!%p221_p12), [#allocation4], %s226_s30 }
  0x1e   : > { %s919_s6 = scalar_lea.vmem (!%p221_p12), [#allocation3], %s585_s4 }
  0x1f   : > { %779 = dma.done.wait (%p883_p7), %s227_s5, 256  }
  0x20   : > { %781 = vsyncadd (%p883_p7), %s227_s5, 4294967040  ;;  %s586_s8 = sshll.u32 %s226_s30, 9  ;;  %s237_s25 = scalar_lea.sflag [#allocation7], %s226_s30 }
  0x21   : > { %s925_s9 = scalar_lea.vmem [#allocation6], %s586_s8 }
  0x22   : > { %783 = dma.done.wait (%p883_p7), %s237_s25, 8192  }
  0x23   : > { %785 = vsyncadd (%p883_p7), %s237_s25, 4294959104  ;;  %p587_p13 = scmp.ne.s32.totalorder %s804_s15, 0 }
  0x25   : > { %280 = sbr.rel (%p587_p13) target bundleno = 45 (0x2d), region = 44 }
  0x2a   : > { %v816_v0 = vmov 0.0  }
  0x2b   : > { %281 = vst [vmem:[#allocation2] sm:$0xff] %v816_v0 }
  0x2c   : > { %282 = vst [vmem:[#allocation2 + $0x8] sm:$0xff] %v816_v0 }
  0x2d PF: > { %v318_v1 = vld [vmem:[%s925_s9 + $0xf8] sm:$0xff]  ;;  %v316_v3 = vld [vmem:[%s925_s9 + $0xe8] sm:$0xff]  ;;  %v317_v7 = vld [vmem:[%s925_s9 + $0xf0] sm:$0xff]  ;;  %p588_p0 = scmp.ne.s32.totalorder %s804_s15, 1 }
  0x2e   : > { %v350_v2 = vld [vmem:[%s925_s9 + $0x1f8] sm:$0xff]  ;;  %391 = vmatpush.msra.mxu2 %v318_v1  ;;  %v348_v4 = vld [vmem:[%s925_s9 + $0x1e8] sm:$0xff]  ;;  %v349_v8 = vld [vmem:[%s925_s9 + $0x1f0] sm:$0xff]  ;;  %351 = vmatpush.msra.mxu0 %v317_v7 }
  0x2f   : > { %411 = vmatpush.msra.mxu3 %v350_v2  ;;  %v314_v5 = vld [vmem:[%s925_s9 + $0xd8] sm:$0xff]  ;;  %v315_v9 = vld [vmem:[%s925_s9 + $0xe0] sm:$0xff]  ;;  %371 = vmatpush.msra.mxu1 %v349_v8  ;;  %v312_v11 = vld [vmem:[%s925_s9 + $0xc8] sm:$0xff] }
  0x30   : > { %v346_v6 = vld [vmem:[%s925_s9 + $0x1d8] sm:$0xff]  ;;  %392 = vmatpush.msra.mxu2 %v316_v3  ;;  %v347_v10 = vld [vmem:[%s925_s9 + $0x1e0] sm:$0xff]  ;;  %v344_v12 = vld [vmem:[%s925_s9 + $0x1c8] sm:$0xff]  ;;  %352 = vmatpush.msra.mxu0 %v315_v9 }
  0x31   : > { %412 = vmatpush.msra.mxu3 %v348_v4  ;;  %v313_v13 = vld [vmem:[%s925_s9 + $0xd0] sm:$0xff]  ;;  %372 = vmatpush.msra.mxu1 %v347_v10  ;;  %v310_v15 = vld [vmem:[%s925_s9 + $0xb8] sm:$0xff]  ;;  %v311_v17 = vld [vmem:[%s925_s9 + $0xc0] sm:$0xff] }
  0x32   : > { %393 = vmatpush.msra.mxu2 %v314_v5  ;;  %v345_v14 = vld [vmem:[%s925_s9 + $0x1d0] sm:$0xff]  ;;  %v342_v16 = vld [vmem:[%s925_s9 + $0x1b8] sm:$0xff]  ;;  %v343_v18 = vld [vmem:[%s925_s9 + $0x1c0] sm:$0xff]  ;;  %353 = vmatpush.msra.mxu0 %v313_v13 }
  0x33   : > { %413 = vmatpush.msra.mxu3 %v346_v6  ;;  %373 = vmatpush.msra.mxu1 %v345_v14  ;;  %v308_v19 = vld [vmem:[%s925_s9 + $0xa8] sm:$0xff]  ;;  %v309_v21 = vld [vmem:[%s925_s9 + $0xb0] sm:$0xff]  ;;  %v306_v23 = vld [vmem:[%s925_s9 + $0x98] sm:$0xff] }
  0x34   : > { %394 = vmatpush.msra.mxu2 %v312_v11  ;;  %v340_v20 = vld [vmem:[%s925_s9 + $0x1a8] sm:$0xff]  ;;  %v341_v22 = vld [vmem:[%s925_s9 + $0x1b0] sm:$0xff]  ;;  %354 = vmatpush.msra.mxu0 %v311_v17  ;;  %v338_v24 = vld [vmem:[%s925_s9 + $0x198] sm:$0xff] }
  0x35   : > { %414 = vmatpush.msra.mxu3 %v344_v12  ;;  %374 = vmatpush.msra.mxu1 %v343_v18  ;;  %v307_v25 = vld [vmem:[%s925_s9 + $0xa0] sm:$0xff]  ;;  %v304_v27 = vld [vmem:[%s925_s9 + $0x88] sm:$0xff]  ;;  %v305_v29 = vld [vmem:[%s925_s9 + $0x90] sm:$0xff] }
  0x36   : > { %395 = vmatpush.msra.mxu2 %v310_v15  ;;  %v339_v26 = vld [vmem:[%s925_s9 + $0x1a0] sm:$0xff]  ;;  %355 = vmatpush.msra.mxu0 %v309_v21  ;;  %v336_v28 = vld [vmem:[%s925_s9 + $0x188] sm:$0xff]  ;;  %v337_v30 = vld [vmem:[%s925_s9 + $0x190] sm:$0xff] }
  0x37   : > { %415 = vmatpush.msra.mxu3 %v342_v16  ;;  %375 = vmatpush.msra.mxu1 %v341_v22  ;;  %v302_v31 = vld [vmem:[%s925_s9 + $0x78] sm:$0xff]  ;;  %v303_v33 = vld [vmem:[%s925_s9 + $0x80] sm:$0xff]  ;;  %v300_v35 = vld [vmem:[%s925_s9 + $0x68] sm:$0xff] }
  0x38   : > { %396 = vmatpush.msra.mxu2 %v308_v19  ;;  %356 = vmatpush.msra.mxu0 %v307_v25  ;;  %v334_v32 = vld [vmem:[%s925_s9 + $0x178] sm:$0xff]  ;;  %v335_v34 = vld [vmem:[%s925_s9 + $0x180] sm:$0xff]  ;;  %v332_v36 = vld [vmem:[%s925_s9 + $0x168] sm:$0xff] }
  0x39   : > { %416 = vmatpush.msra.mxu3 %v340_v20  ;;  %376 = vmatpush.msra.mxu1 %v339_v26  ;;  %v301_v37 = vld [vmem:[%s925_s9 + $0x70] sm:$0xff]  ;;  %v298_v39 = vld [vmem:[%s925_s9 + $0x58] sm:$0xff]  ;;  %v299_v41 = vld [vmem:[%s925_s9 + $0x60] sm:$0xff] }
  0x3a   : > { %397 = vmatpush.msra.mxu2 %v306_v23  ;;  %357 = vmatpush.msra.mxu0 %v305_v29  ;;  %v333_v38 = vld [vmem:[%s925_s9 + $0x170] sm:$0xff]  ;;  %v330_v40 = vld [vmem:[%s925_s9 + $0x158] sm:$0xff]  ;;  %v331_v42 = vld [vmem:[%s925_s9 + $0x160] sm:$0xff] }
  0x3b   : > { %417 = vmatpush.msra.mxu3 %v338_v24  ;;  %377 = vmatpush.msra.mxu1 %v337_v30  ;;  %v296_v43 = vld [vmem:[%s925_s9 + $0x48] sm:$0xff]  ;;  %v297_v45 = vld [vmem:[%s925_s9 + $0x50] sm:$0xff]  ;;  %v294_v47 = vld [vmem:[%s925_s9 + $0x38] sm:$0xff] }
  0x3c   : > { %398 = vmatpush.msra.mxu2 %v304_v27  ;;  %358 = vmatpush.msra.mxu0 %v303_v33  ;;  %v328_v44 = vld [vmem:[%s925_s9 + $0x148] sm:$0xff]  ;;  %v329_v46 = vld [vmem:[%s925_s9 + $0x150] sm:$0xff]  ;;  %v326_v48 = vld [vmem:[%s925_s9 + $0x138] sm:$0xff] }
  0x3d   : > { %418 = vmatpush.msra.mxu3 %v336_v28  ;;  %378 = vmatpush.msra.mxu1 %v335_v34  ;;  %v295_v49 = vld [vmem:[%s925_s9 + $0x40] sm:$0xff]  ;;  %v292_v51 = vld [vmem:[%s925_s9 + $0x28] sm:$0xff]  ;;  %v293_v53 = vld [vmem:[%s925_s9 + $0x30] sm:$0xff] }
  0x3e   : > { %399 = vmatpush.msra.mxu2 %v302_v31  ;;  %359 = vmatpush.msra.mxu0 %v301_v37  ;;  %v327_v50 = vld [vmem:[%s925_s9 + $0x140] sm:$0xff]  ;;  %v324_v52 = vld [vmem:[%s925_s9 + $0x128] sm:$0xff]  ;;  %v325_v54 = vld [vmem:[%s925_s9 + $0x130] sm:$0xff] }
  0x3f   : > { %419 = vmatpush.msra.mxu3 %v334_v32  ;;  %379 = vmatpush.msra.mxu1 %v333_v38  ;;  %v290_v55 = vld [vmem:[%s925_s9 + $0x18] sm:$0xff]  ;;  %v291_v57 = vld [vmem:[%s925_s9 + $0x20] sm:$0xff]  ;;  %v288_v59 = vld [vmem:[%s925_s9 + $0x8] sm:$0xff] }
  0x40   : > { %400 = vmatpush.msra.mxu2 %v300_v35  ;;  %360 = vmatpush.msra.mxu0 %v299_v41  ;;  %v322_v56 = vld [vmem:[%s925_s9 + $0x118] sm:$0xff]  ;;  %v323_v58 = vld [vmem:[%s925_s9 + $0x120] sm:$0xff]  ;;  %v320_v60 = vld [vmem:[%s925_s9 + $0x108] sm:$0xff] }
  0x41   : > { %420 = vmatpush.msra.mxu3 %v332_v36  ;;  %380 = vmatpush.msra.mxu1 %v331_v42  ;;  %v285_v61 = vld [vmem:[%s919_s6] sm:$0xff]  ;;  %v286_v62 = vld [vmem:[%s919_s6 + $0x8] sm:$0xff] }
  0x42   : > { %401 = vmatpush.msra.mxu2 %v298_v39  ;;  %361 = vmatpush.msra.mxu0 %v297_v45  ;;  %v289_v63 = vld [vmem:[%s925_s9 + $0x10] sm:$0xff]  ;;  %v287_v1 = vld [vmem:[%s925_s9] sm:$0xff]  ;;  %v284_v8 = vld [vmem:[#allocation2 + $0x8] sm:$0xff] }
  0x43   : > { %421 = vmatpush.msra.mxu3 %v330_v40  ;;  %381 = vmatpush.msra.mxu1 %v329_v46  ;;  %v321_v0 = vld [vmem:[%s925_s9 + $0x110] sm:$0xff]  ;;  %v319_v2 = vld [vmem:[%s925_s9 + $0x100] sm:$0xff] }
  0x44   : > { %402 = vmatpush.msra.mxu2 %v296_v43  ;;  %362 = vmatpush.msra.mxu0 %v295_v49  ;;  %v283_v4 = vld [vmem:[#allocation2] sm:$0xff] }
  0x45   : > { %422 = vmatpush.msra.mxu3 %v328_v44  ;;  %382 = vmatpush.msra.mxu1 %v327_v50 }
  0x46   : > { %403 = vmatpush.msra.mxu2 %v294_v47  ;;  %363 = vmatpush.msra.mxu0 %v293_v53 }
  0x47   : > { %423 = vmatpush.msra.mxu3 %v326_v48  ;;  %383 = vmatpush.msra.mxu1 %v325_v54 }
  0x48   : > { %404 = vmatpush.msra.mxu2 %v292_v51  ;;  %364 = vmatpush.msra.mxu0 %v291_v57 }
  0x49   : > { %424 = vmatpush.msra.mxu3 %v324_v52  ;;  %384 = vmatpush.msra.mxu1 %v323_v58 }
  0x4a   : > { %405 = vmatpush.msra.mxu2 %v290_v55  ;;  %365 = vmatpush.msra.mxu0 %v289_v63 }
  0x4b   : > { %425 = vmatpush.msra.mxu3 %v322_v56  ;;  %385 = vmatpush.msra.mxu1 %v321_v0 }
  0x4c   : > { %406 = vmatpush.msra.mxu2 %v288_v59  ;;  %366 = vmatpush.msra.mxu0 %v287_v1 }
  0x4d   : > { %426 = vmatpush.msra.mxu3 %v320_v60  ;;  %407 = vmatmul.f32.vlgmr.msra.gmra.mxu2 %v285_v61 }
  0x4e   : > { %427 = vmatmul.f32.vlgmr.msra.gmra.mxu3 %v286_v62  ;;  %386 = vmatpush.msra.mxu1 %v319_v2 }
  0x4f   : > { %367 = vmatmul.f32.vlgmr.msra.gmra.mxu0 %v285_v61  ;;  %387 = vmatmul.f32.vlgmr.msra.gmra.mxu1 %v286_v62 }
  0xcc   : > { %v368_v3 = vpop.f32.mrf.mxu0  ;;  %v388_v5 = vpop.f32.mrf.mxu1 }
  0xcd   : > { %v389_v6 = vadd.f32 %v388_v5, %v368_v3 }
  0xcf   : > { %v431_v10 = vadd.f32 %v389_v6, %v283_v4 }
  0xd0   : > { %v408_v7 = vpop.f32.mrf.mxu2 }
  0xd1   : > { %v428_v9 = vpop.f32.mrf.mxu3  ;;  %433 = vst [vmem:[#allocation2] sm:$0xff] %v431_v10 }
  0xd2   : > { %v429_v11 = vadd.f32 %v428_v9, %v408_v7  ;;  %438 = sbr.rel (%p588_p0) target bundleno = 225 (0xe1), region = 48 }
  0xd4   : > { %v432_v12 = vadd.f32 %v429_v11, %v284_v8 }
  0xd6   : > { %434 = vst [vmem:[#allocation2 + $0x8] sm:$0xff] %v432_v12 }
  0xd7   : > { %v441_v14 = vld [vmem:[%s1027_s2] sm:$0x3] }
  0xd8   : > { %v439_v13 = vld [vmem:[#allocation2] sm:$0xff]  ;;  %v443_v16 = vperm.slane %v441_v14, 0  ;;  %v444_v17 = vperm.slane %v441_v14, 1 }
  0xda   : > { %v447_v18 = vadd.f32 %v443_v16, %v439_v13 }
  0xdc   : > { %449 = vst [vmem:[#allocation8] sm:$0xff] %v447_v18 }
  0xdd   : > { %v440_v15 = vld [vmem:[#allocation2 + $0x8] sm:$0xff] }
  0xde   : > { %v448_v19 = vadd.f32 %v444_v17, %v440_v15 }
  0xe0   : > { %450 = vst [vmem:[#allocation8 + $0x8] sm:$0xff] %v448_v19 }
  0xe1 PF: > { %p612_p1 = scmp.eq.s32.totalorder %s573_s18, 1  ;;  %s464_s15 = sshll.u32 %s1028_s3, 4  ;;  %s465_s15 = int_to_ptr.hbm [resolvable:$true] %s464_s15 }
  0xe2   : > { %s817_s12 = smov [#allocation8]  }
  0xe3   : > { %s462_s20 = sshll.u32 %s817_s12, 4  ;;  %s463_s20 = int_to_ptr.vmem [resolvable:$true] %s462_s20 }
  0xe4   : > { %601 = dma.vmem_to_hbm [thread:$0]  (%p612_p1), %s463_s20, 256, %s465_s15, [#allocation5]  }
  0xe5   : > { %787 = dma.done.wait (%p612_p1), [#allocation5], 256  }
  0xe6   : > { %789 = vsyncadd (%p612_p1), [#allocation5], 4294967040 }
  0xe7 PF: > { %s20_s17 = sadd.s32 1, %s812_s17   ;;  %s1032_s12 = smov %s796_s13 }
  0xe8   : > { %p17_p2 = scmp.ge.s32.totalorder %s20_s17, 4   ;;  %s1033_s13 = smov %s800_s14 }
  0xe9   : > { %s1034_s14 = smov %s889_s24  ;;  %s1035_s15 = smov %s808_s16 }
  0xea   : > { %s1036_s16 = smov %s1038_s19  ;;  %19 = sbr.rel (!%p17_p2) target bundleno = 7 (0x7), region = 94 }
  0xef   :  { %478 = vsyncpa [#allocation4], 1 }
  0xf0   :  { %480 = vsyncpa [#allocation4 + $0x1], 1 }
  0xf1   :  { %481 = vsyncpa [#allocation7], 1 }
  0xf2   :  { %483 = vsyncpa [#allocation7 + $0x1], 1 }
  0xf3   :  { %484 = vsyncpa [#allocation5], 1 }
  0xf4   :  { %486 = vsyncpa [#allocation5 + $0x1], 1 }

</bundles_post_ra>
